<compile_context>
chip_gen: v7x
topology: tpu7x:2x2x1
jax: 0.10.0
libtpu: 0.0.40
codegen_flags: <defaults>
</compile_context>

<pallas_src>
import jax
import jax.numpy as jnp
from jax.experimental import pallas as pl
from jax.experimental.pallas import tpu as pltpu

L, D, K, C = 500, 128, 1, 2
LP = 512            # L padded to a multiple of 128 (zero-pad, numerically exact)
TN_MAX = 2048       # max instance-tile rows
NEG_INF = -1e30     # Python float: finite sentinel, NOT a captured jnp constant


def attention_kernel(n_ref, x_ref, w1_ref, wa_ref, ba_ref, wvt_ref, bv_ref,
                     scores_ref, m_out_ref, l_out_ref, macc_out_ref,
                     m_sc, l_sc, macc_sc):
    c = pl.program_id(0)                 # core / bag-half index ("parallel")
    i = pl.program_id(1)                 # instance tile within this half
    nt = pl.num_programs(1)
    tn = scores_ref.shape[1]

    @pl.when(i == 0)
    def _init():
        m_sc[...] = jnp.full_like(m_sc, NEG_INF)
        l_sc[...] = jnp.zeros_like(l_sc)
        macc_sc[...] = jnp.zeros_like(macc_sc)

    # feature_extractor_part2: H = ReLU(x_aug @ W1_aug)  (bias folded into W1).
    # Only the bf16 copy of H is materialized.
    hb = jnp.maximum(
        jnp.dot(x_ref[...], w1_ref[...], preferred_element_type=jnp.float32),
        0.0).astype(jnp.bfloat16)                                    # (TN, LP)

    # attention MLP part 1: att = tanh(H @ Wa + ba)                   (TN, D) f32
    att = jnp.tanh(
        jnp.dot(hb, wa_ref[...], preferred_element_type=jnp.float32) + ba_ref[...])

    # attention MLP part 2, lane-dense: s = Wv^T @ att^T              (1, TN) f32
    s_row = jax.lax.dot_general(
        wvt_ref[...], att.astype(jnp.bfloat16),
        dimension_numbers=(((1,), (1,)), ((), ())),
        preferred_element_type=jnp.float32) + bv_ref[...]

    # mask the bag-padding rows of this tile
    col = jax.lax.broadcasted_iota(jnp.int32, (1, tn), 1) + (c * nt + i) * tn
    s_row = jnp.where(col < n_ref[0], s_row, NEG_INF)
    scores_ref[...] = s_row                    # lane-dense raw attention scores

    # flash-style online softmax + attention-weighted pooling on the MXU
    m_prev = m_sc[...]                                               # (1, 1)
    m_new = jnp.maximum(m_prev, jnp.max(s_row, axis=1, keepdims=True))
    corr = jnp.exp(m_prev - m_new)                                   # (1, 1)
    p = jnp.exp(s_row - m_new)                                       # (1, TN)
    l_sc[...] = corr * l_sc[...] + jnp.sum(p, axis=1, keepdims=True)
    macc_sc[...] = corr * macc_sc[...] + jnp.dot(
        p.astype(jnp.bfloat16), hb, preferred_element_type=jnp.float32)
    m_sc[...] = m_new

    # emit this core's partial softmax state on its last tile
    @pl.when(i == nt - 1)
    def _finalize():
        m_out_ref[...] = jnp.broadcast_to(m_sc[...], m_out_ref.shape)
        l_out_ref[...] = jnp.broadcast_to(l_sc[...], l_out_ref.shape)
        macc_out_ref[...] = macc_sc[...]


def _round_up(v, m):
    return (v + m - 1) // m * m


def _cdiv(a, b):
    return -(-a // b)


def attention_forward(x, params):
    """x: (1, N, d) bag like the PyTorch module; returns (Y_prob, Y_hat, A)."""
    n, d = x.shape[-2], x.shape[-1]
    x2 = x.reshape(n, d).astype(jnp.float32)        # == x.squeeze(0).float()

    # fold b1 into the first matmul: ones column on x, b1 as extra row of W1
    x_aug = jnp.concatenate([x2, jnp.ones((n, 1), jnp.float32)], axis=1)
    d_aug = d + 1

    # instance tiling: one lane-dense tile for small bags, balanced big tiles else
    if n <= TN_MAX:
        num_tiles = 1
        tn = _round_up(max(n, 1), 128)
    else:
        num_tiles = _cdiv(n, TN_MAX)
        tn = _round_up(_cdiv(n, num_tiles), 128)
    num_cores = 2 if num_tiles >= 2 else 1          # give v7x's 2nd TC work on big bags
    tiles_per_core = _cdiv(num_tiles, num_cores)
    total_tiles = num_cores * tiles_per_core
    n_pad = total_tiles * tn

    x_p = jnp.pad(x_aug, ((0, n_pad - n), (0, 0))).astype(jnp.bfloat16)

    # zero-pad L -> LP (exact) and cast weight matrices to bf16
    pad_l = LP - L
    w1 = jnp.pad(params["w1"], ((0, 0), (0, pad_l)))                       # (d, LP)
    b1 = jnp.pad(params["b1"], ((0, 0), (0, pad_l)))                       # (1, LP)
    w1_aug = jnp.concatenate([w1, b1], axis=0).astype(jnp.bfloat16)        # (d+1, LP)
    wa = jnp.pad(params["wa"], ((0, pad_l), (0, 0))).astype(jnp.bfloat16)  # (LP, D)
    ba = params["ba"].astype(jnp.float32)                                  # (1, D)
    wvt = params["wv"].T.astype(jnp.bfloat16)                              # (K, D)
    bv = params["bv"].astype(jnp.float32)                                  # (1, K)

    n_actual = jnp.array([n], jnp.int32)

    scores, m_out, l_out, macc_out = pl.pallas_call(
        attention_kernel,
        out_shape=(
            jax.ShapeDtypeStruct((1, n_pad), jnp.float32),          # raw scores
            jax.ShapeDtypeStruct((num_cores, 128), jnp.float32),    # partial max
            jax.ShapeDtypeStruct((num_cores, 128), jnp.float32),    # partial sum
            jax.ShapeDtypeStruct((num_cores, LP), jnp.float32),     # partial pooled
        ),
        grid_spec=pltpu.PrefetchScalarGridSpec(
            num_scalar_prefetch=1,
            grid=(num_cores, tiles_per_core),
            in_specs=[
                pl.BlockSpec((tn, d_aug), lambda c, i, nr: (c * tiles_per_core + i, 0)),
                pl.BlockSpec((d_aug, LP), lambda c, i, nr: (0, 0)),   # resident weights
                pl.BlockSpec((LP, D), lambda c, i, nr: (0, 0)),
                pl.BlockSpec((1, D), lambda c, i, nr: (0, 0)),
                pl.BlockSpec((K, D), lambda c, i, nr: (0, 0)),
                pl.BlockSpec((1, K), lambda c, i, nr: (0, 0)),
            ],
            out_specs=[
                pl.BlockSpec((1, tn), lambda c, i, nr: (0, c * tiles_per_core + i)),
                pl.BlockSpec((1, 128), lambda c, i, nr: (c, 0)),
                pl.BlockSpec((1, 128), lambda c, i, nr: (c, 0)),
                pl.BlockSpec((1, LP), lambda c, i, nr: (c, 0)),
            ],
            scratch_shapes=[
                pltpu.VMEM((1, 1), jnp.float32),    # running max
                pltpu.VMEM((1, 1), jnp.float32),    # running sum
                pltpu.VMEM((1, LP), jnp.float32),   # running pooled feature
            ],
        ),
        compiler_params=pltpu.CompilerParams(
            dimension_semantics=("parallel", "arbitrary"),
            vmem_limit_bytes=48 * 1024 * 1024),
    )(n_actual, x_p, w1_aug, wa, ba, wvt, bv)

    # merge per-core online-softmax partials (exact f32 math, runs once per bag)
    m_parts = m_out[:, :1]                                           # (cores, 1)
    l_parts = l_out[:, :1]                                           # (cores, 1)
    m_glob = jnp.max(m_parts, axis=0, keepdims=True)                 # (1, 1)
    corr = jnp.exp(m_parts - m_glob)                                 # (cores, 1)
    l_glob = jnp.sum(l_parts * corr, axis=0, keepdims=True)          # (1, 1)
    macc_glob = jnp.sum(macc_out * corr, axis=0, keepdims=True)      # (1, LP)
    m_vec = macc_glob / l_glob                                       # exact division

    # classifier (1,500)@(500,2) + sigmoid — negligible XLA ops, full f32
    logits = m_vec[:, :L] @ params["wc"].astype(jnp.float32) + params["bc"].astype(jnp.float32)
    y_prob = jax.nn.sigmoid(logits)
    y_hat = jnp.argmax(y_prob, axis=1)                               # Y_prob.max(1)[1]
    a = jax.nn.softmax(scores[:, :n], axis=1)                        # softmax(A.T, dim=1)
    return y_prob, y_hat, a


if __name__ == "__main__":
    key = jax.random.PRNGKey(0)
    N, d = 8, 32  # small bag size / feature dim
    keys = jax.random.split(key, 9)

    def uinit(k, shape, fan_in):
        bound = 1.0 / jnp.sqrt(jnp.float32(fan_in))
        return jax.random.uniform(k, shape, jnp.float32, -bound, bound)

    # PyTorch nn.Linear-style deterministic init, weights stored as (in, out)
    params = {
        "w1": uinit(keys[0], (d, L), d),
        "b1": uinit(keys[1], (1, L), d),
        "wa": uinit(keys[2], (L, D), L),
        "ba": uinit(keys[3], (1, D), L),
        "wv": uinit(keys[4], (D, K), D),
        "bv": uinit(keys[5], (1, K), D),
        "wc": uinit(keys[6], (L * K, C), L * K),
        "bc": uinit(keys[7], (1, C), L * K),
    }
    x = jax.random.normal(keys[8], (1, N, d), jnp.float32)

    Y_prob, Y_hat, A = attention_forward(x, params)
    jax.block_until_ready((Y_prob, Y_hat, A))

    # pure-JAX f32 reference (unpadded weights) for a sanity check
    x2 = x.reshape(N, d)
    H = jnp.maximum(x2 @ params["w1"] + params["b1"], 0.0)
    A_ref = jax.nn.softmax(
        (jnp.tanh(H @ params["wa"] + params["ba"]) @ params["wv"]
         + params["bv"]).T, axis=1)
    Y_ref = jax.nn.sigmoid((A_ref @ H) @ params["wc"] + params["bc"])

    assert Y_prob.shape == (1, C)
    assert Y_hat.shape == (1,)
    assert A.shape == (1, N)
    assert jnp.max(jnp.abs(A - A_ref)) < 2e-2, "attention weights mismatch"
    assert jnp.max(jnp.abs(Y_prob - Y_ref)) < 5e-2, "Y_prob mismatch"
    print("KERNEL_OK")
</pallas_src>

<mosaic_0001>
module attributes {stable_mosaic.version = 11 : i64} {
  func.func @attention_kernel(%arg0: i32, %arg1: i32, %arg2: memref<1xi32, #tpu.memory_space<smem>>, %arg3: memref<128x33xbf16, #tpu.memory_space<vmem>>, %arg4: memref<33x512xbf16, #tpu.memory_space<vmem>>, %arg5: memref<512x128xbf16, #tpu.memory_space<vmem>>, %arg6: memref<1x128xf32, #tpu.memory_space<vmem>>, %arg7: memref<1x128xbf16, #tpu.memory_space<vmem>>, %arg8: memref<1x1xf32, #tpu.memory_space<vmem>>, %arg9: memref<1x128xf32, #tpu.memory_space<vmem>>, %arg10: memref<1x128xf32, #tpu.memory_space<vmem>>, %arg11: memref<1x128xf32, #tpu.memory_space<vmem>>, %arg12: memref<1x512xf32, #tpu.memory_space<vmem>>, %arg13: memref<1x1xf32, #tpu.memory_space<vmem>>, %arg14: memref<1x1xf32, #tpu.memory_space<vmem>>, %arg15: memref<1x512xf32, #tpu.memory_space<vmem>>) attributes {dimension_semantics = [#tpu.dimension_semantics<parallel>, #tpu.dimension_semantics<arbitrary>], iteration_bounds = array<i64: 1, 1>, scalar_prefetch = 1 : i64, scratch_operands = 3 : i64, tpu.core_type = #tpu.core_type<tc>, window_params = [{transform_indices = @transform_0, window_bounds = array<i64: 128, 33>}, {pipeline_mode = #tpu.pipeline_mode<synchronous>, transform_indices = @transform_1, window_bounds = array<i64: 33, 512>}, {pipeline_mode = #tpu.pipeline_mode<synchronous>, transform_indices = @transform_2, window_bounds = array<i64: 512, 128>}, {pipeline_mode = #tpu.pipeline_mode<synchronous>, transform_indices = @transform_3, window_bounds = array<i64: 1, 128>}, {pipeline_mode = #tpu.pipeline_mode<synchronous>, transform_indices = @transform_4, window_bounds = array<i64: 1, 128>}, {pipeline_mode = #tpu.pipeline_mode<synchronous>, transform_indices = @transform_5, window_bounds = array<i64: 1, 1>}, {transform_indices = @transform_6, window_bounds = array<i64: 1, 128>}, {transform_indices = @transform_7, window_bounds = array<i64: 1, 128>}, {transform_indices = @transform_8, window_bounds = array<i64: 1, 128>}, {transform_indices = @transform_9, window_bounds = array<i64: 1, 512>}]} {
    %c0_i32 = arith.constant 0 : i32
    %0 = arith.cmpi eq, %arg1, %c0_i32 : i32
    %1 = arith.extui %0 : i1 to i32
    %c0_i32_0 = arith.constant 0 : i32
    %2 = arith.cmpi ne, %1, %c0_i32_0 : i32
    scf.if %2 {
      %cst_36 = arith.constant -1.000000e+30 : f32
      %59 = vector.broadcast %cst_36 : f32 to vector<1x1xf32>
      %c0_37 = arith.constant 0 : index
      %c0_38 = arith.constant 0 : index
      %60 = vector.load %arg13[%c0_37, %c0_38] : memref<1x1xf32, #tpu.memory_space<vmem>>, vector<1x1xf32>
      tpu.vector_store %arg13[%c0_37, %c0_38], %59 {strides = array<i32>} : memref<1x1xf32, #tpu.memory_space<vmem>>, vector<1x1xf32>,
      %cst_39 = arith.constant 0.000000e+00 : f32
      %61 = vector.broadcast %cst_39 : f32 to vector<1x1xf32>
      %c0_40 = arith.constant 0 : index
      %c0_41 = arith.constant 0 : index
      %62 = vector.load %arg14[%c0_40, %c0_41] : memref<1x1xf32, #tpu.memory_space<vmem>>, vector<1x1xf32>
      tpu.vector_store %arg14[%c0_40, %c0_41], %61 {strides = array<i32>} : memref<1x1xf32, #tpu.memory_space<vmem>>, vector<1x1xf32>,
      %cst_42 = arith.constant 0.000000e+00 : f32
      %63 = vector.broadcast %cst_42 : f32 to vector<1x512xf32>
      %c0_43 = arith.constant 0 : index
      %c0_44 = arith.constant 0 : index
      %64 = vector.load %arg15[%c0_43, %c0_44] : memref<1x512xf32, #tpu.memory_space<vmem>>, vector<1x512xf32>
      tpu.vector_store %arg15[%c0_43, %c0_44], %63 {strides = array<i32>} : memref<1x512xf32, #tpu.memory_space<vmem>>, vector<1x512xf32>,
    } else {
    }
    %c0 = arith.constant 0 : index
    %c0_1 = arith.constant 0 : index
    %3 = vector.load %arg3[%c0, %c0_1] : memref<128x33xbf16, #tpu.memory_space<vmem>>, vector<128x33xbf16>
    %c0_2 = arith.constant 0 : index
    %c0_3 = arith.constant 0 : index
    %4 = vector.load %arg4[%c0_2, %c0_3] : memref<33x512xbf16, #tpu.memory_space<vmem>>, vector<33x512xbf16>
    %cst = arith.constant dense<0.000000e+00> : vector<128x512xf32>
    %5 = tpu.matmul %3, %4, %cst {dimension_numbers = #tpu.dot_dimension_numbers<[1], [0], [0], [1], [0, 0, 1, 1], [], []>} : vector<128x33xbf16>, vector<33x512xbf16>, vector<128x512xf32> -> vector<128x512xf32>
    %cst_4 = arith.constant 0.000000e+00 : f32
    %6 = vector.broadcast %cst_4 : f32 to vector<128x512xf32>
    %7 = arith.maximumf %5, %6 : vector<128x512xf32>
    %8 = arith.truncf %7 : vector<128x512xf32> to vector<128x512xbf16>
    %c0_5 = arith.constant 0 : index
    %c0_6 = arith.constant 0 : index
    %9 = vector.load %arg5[%c0_5, %c0_6] : memref<512x128xbf16, #tpu.memory_space<vmem>>, vector<512x128xbf16>
    %cst_7 = arith.constant dense<0.000000e+00> : vector<128x128xf32>
    %10 = tpu.matmul %8, %9, %cst_7 {dimension_numbers = #tpu.dot_dimension_numbers<[1], [0], [0], [1], [0, 0, 1, 1], [], []>} : vector<128x512xbf16>, vector<512x128xbf16>, vector<128x128xf32> -> vector<128x128xf32>
    %c0_8 = arith.constant 0 : index
    %c0_9 = arith.constant 0 : index
    %11 = vector.load %arg6[%c0_8, %c0_9] : memref<1x128xf32, #tpu.memory_space<vmem>>, vector<1x128xf32>
    %12 = vector.broadcast %11 : vector<1x128xf32> to vector<128x128xf32>
    %13 = arith.addf %10, %12 : vector<128x128xf32>
    %14 = math.tanh %13 : vector<128x128xf32>
    %c0_10 = arith.constant 0 : index
    %c0_11 = arith.constant 0 : index
    %15 = vector.load %arg7[%c0_10, %c0_11] : memref<1x128xbf16, #tpu.memory_space<vmem>>, vector<1x128xbf16>
    %16 = arith.truncf %14 : vector<128x128xf32> to vector<128x128xbf16>
    %cst_12 = arith.constant dense<0.000000e+00> : vector<1x128xf32>
    %17 = tpu.matmul %15, %16, %cst_12 {dimension_numbers = #tpu.dot_dimension_numbers<[1], [1], [0], [0], [0, 0, 1, 0], [], []>} : vector<1x128xbf16>, vector<128x128xbf16>, vector<1x128xf32> -> vector<1x128xf32>
    %c0_13 = arith.constant 0 : index
    %c0_14 = arith.constant 0 : index
    %18 = vector.load %arg8[%c0_13, %c0_14] : memref<1x1xf32, #tpu.memory_space<vmem>>, vector<1x1xf32>
    %19 = vector.broadcast %18 : vector<1x1xf32> to vector<1x128xf32>
    %20 = arith.addf %17, %19 : vector<1x128xf32>
    %21 = tpu.iota {dimensions = array<i32: 1>} : vector<1x128xi32>
    %c1_i32 = arith.constant 1 : i32
    %22 = arith.muli %arg0, %c1_i32 : i32
    %23 = arith.addi %22, %arg1 : i32
    %c128_i32 = arith.constant 128 : i32
    %24 = arith.muli %23, %c128_i32 : i32
    %25 = vector.broadcast %24 : i32 to vector<1x128xi32>
    %26 = arith.addi %21, %25 : vector<1x128xi32>
    %c0_15 = arith.constant 0 : index
    %27 = memref.load %arg2[%c0_15] : memref<1xi32, #tpu.memory_space<smem>>
    %28 = vector.broadcast %27 : i32 to vector<1x128xi32>
    %29 = arith.cmpi slt, %26, %28 : vector<1x128xi32>
    %cst_16 = arith.constant -1.000000e+30 : f32
    %30 = vector.broadcast %cst_16 : f32 to vector<1x128xf32>
    %31 = arith.select %29, %20, %30 : vector<1x128xi1>, vector<1x128xf32>
    %c0_17 = arith.constant 0 : index
    %c0_18 = arith.constant 0 : index
    %32 = vector.load %arg9[%c0_17, %c0_18] : memref<1x128xf32, #tpu.memory_space<vmem>>, vector<1x128xf32>
    tpu.vector_store %arg9[%c0_17, %c0_18], %31 {strides = array<i32>} : memref<1x128xf32, #tpu.memory_space<vmem>>, vector<1x128xf32>,
    %c0_19 = arith.constant 0 : index
    %c0_20 = arith.constant 0 : index
    %33 = vector.load %arg13[%c0_19, %c0_20] : memref<1x1xf32, #tpu.memory_space<vmem>>, vector<1x1xf32>
    %cst_21 = arith.constant dense<0xFF800000> : vector<1xf32>
    %34 = vector.multi_reduction <maximumf>, %31, %cst_21 [1] : vector<1x128xf32> to vector<1xf32>
    %35 = vector.shape_cast %34 : vector<1xf32> to vector<1x1xf32>
    %36 = arith.maximumf %33, %35 : vector<1x1xf32>
    %37 = arith.subf %33, %36 : vector<1x1xf32>
    %38 = math.exp %37 : vector<1x1xf32>
    %39 = vector.broadcast %36 : vector<1x1xf32> to vector<1x128xf32>
    %40 = arith.subf %31, %39 : vector<1x128xf32>
    %41 = math.exp %40 : vector<1x128xf32>
    %c0_22 = arith.constant 0 : index
    %c0_23 = arith.constant 0 : index
    %42 = vector.load %arg14[%c0_22, %c0_23] : memref<1x1xf32, #tpu.memory_space<vmem>>, vector<1x1xf32>
    %43 = arith.mulf %38, %42 : vector<1x1xf32>
    %cst_24 = arith.constant dense<0.000000e+00> : vector<1xf32>
    %44 = vector.multi_reduction <add>, %41, %cst_24 [1] : vector<1x128xf32> to vector<1xf32>
    %45 = vector.shape_cast %44 : vector<1xf32> to vector<1x1xf32>
    %46 = arith.addf %43, %45 : vector<1x1xf32>
    %c0_25 = arith.constant 0 : index
    %c0_26 = arith.constant 0 : index
    %47 = vector.load %arg14[%c0_25, %c0_26] : memref<1x1xf32, #tpu.memory_space<vmem>>, vector<1x1xf32>
    tpu.vector_store %arg14[%c0_25, %c0_26], %46 {strides = array<i32>} : memref<1x1xf32, #tpu.memory_space<vmem>>, vector<1x1xf32>,
    %c0_27 = arith.constant 0 : index
    %c0_28 = arith.constant 0 : index
    %48 = vector.load %arg15[%c0_27, %c0_28] : memref<1x512xf32, #tpu.memory_space<vmem>>, vector<1x512xf32>
    %49 = vector.broadcast %38 : vector<1x1xf32> to vector<1x512xf32>
    %50 = arith.mulf %49, %48 : vector<1x512xf32>
    %51 = arith.truncf %41 : vector<1x128xf32> to vector<1x128xbf16>
    %cst_29 = arith.constant dense<0.000000e+00> : vector<1x512xf32>
    %52 = tpu.matmul %51, %8, %cst_29 {dimension_numbers = #tpu.dot_dimension_numbers<[1], [0], [0], [1], [0, 0, 1, 1], [], []>} : vector<1x128xbf16>, vector<128x512xbf16>, vector<1x512xf32> -> vector<1x512xf32>
    %53 = arith.addf %50, %52 : vector<1x512xf32>
    %c0_30 = arith.constant 0 : index
    %c0_31 = arith.constant 0 : index
    %54 = vector.load %arg15[%c0_30, %c0_31] : memref<1x512xf32, #tpu.memory_space<vmem>>, vector<1x512xf32>
    tpu.vector_store %arg15[%c0_30, %c0_31], %53 {strides = array<i32>} : memref<1x512xf32, #tpu.memory_space<vmem>>, vector<1x512xf32>,
    %c0_32 = arith.constant 0 : index
    %c0_33 = arith.constant 0 : index
    %55 = vector.load %arg13[%c0_32, %c0_33] : memref<1x1xf32, #tpu.memory_space<vmem>>, vector<1x1xf32>
    tpu.vector_store %arg13[%c0_32, %c0_33], %36 {strides = array<i32>} : memref<1x1xf32, #tpu.memory_space<vmem>>, vector<1x1xf32>,
    %c0_i32_34 = arith.constant 0 : i32
    %56 = arith.cmpi eq, %arg1, %c0_i32_34 : i32
    %57 = arith.extui %56 : i1 to i32
    %c0_i32_35 = arith.constant 0 : i32
    %58 = arith.cmpi ne, %57, %c0_i32_35 : i32
    scf.if %58 {
      %c0_36 = arith.constant 0 : index
      %c0_37 = arith.constant 0 : index
      %59 = vector.load %arg13[%c0_36, %c0_37] : memref<1x1xf32, #tpu.memory_space<vmem>>, vector<1x1xf32>
      %60 = vector.shape_cast %59 : vector<1x1xf32> to vector<1x1xf32>
      %61 = vector.broadcast %60 : vector<1x1xf32> to vector<1x128xf32>
      %c0_38 = arith.constant 0 : index
      %c0_39 = arith.constant 0 : index
      %62 = vector.load %arg10[%c0_38, %c0_39] : memref<1x128xf32, #tpu.memory_space<vmem>>, vector<1x128xf32>
      tpu.vector_store %arg10[%c0_38, %c0_39], %61 {strides = array<i32>} : memref<1x128xf32, #tpu.memory_space<vmem>>, vector<1x128xf32>,
      %c0_40 = arith.constant 0 : index
      %c0_41 = arith.constant 0 : index
      %63 = vector.load %arg14[%c0_40, %c0_41] : memref<1x1xf32, #tpu.memory_space<vmem>>, vector<1x1xf32>
      %64 = vector.shape_cast %63 : vector<1x1xf32> to vector<1x1xf32>
      %65 = vector.broadcast %64 : vector<1x1xf32> to vector<1x128xf32>
      %c0_42 = arith.constant 0 : index
      %c0_43 = arith.constant 0 : index
      %66 = vector.load %arg11[%c0_42, %c0_43] : memref<1x128xf32, #tpu.memory_space<vmem>>, vector<1x128xf32>
      tpu.vector_store %arg11[%c0_42, %c0_43], %65 {strides = array<i32>} : memref<1x128xf32, #tpu.memory_space<vmem>>, vector<1x128xf32>,
      %c0_44 = arith.constant 0 : index
      %c0_45 = arith.constant 0 : index
      %67 = vector.load %arg15[%c0_44, %c0_45] : memref<1x512xf32, #tpu.memory_space<vmem>>, vector<1x512xf32>
      %c0_46 = arith.constant 0 : index
      %c0_47 = arith.constant 0 : index
      %68 = vector.load %arg12[%c0_46, %c0_47] : memref<1x512xf32, #tpu.memory_space<vmem>>, vector<1x512xf32>
      tpu.vector_store %arg12[%c0_46, %c0_47], %67 {strides = array<i32>} : memref<1x512xf32, #tpu.memory_space<vmem>>, vector<1x512xf32>,
    } else {
    }
    return
  }
  func.func @transform_0(%arg0: i32, %arg1: i32, %arg2: memref<1xi32, #tpu.memory_space<smem>>) -> (i32, i32) {
    %c1_i32 = arith.constant 1 : i32
    %0 = arith.muli %arg0, %c1_i32 : i32
    %1 = arith.addi %0, %arg1 : i32
    %c0_i32 = arith.constant 0 : i32
    %c0_i32_0 = arith.constant 0 : i32
    return %1, %c0_i32 : i32, i32
  }
  func.func @transform_1(%arg0: i32, %arg1: i32, %arg2: memref<1xi32, #tpu.memory_space<smem>>) -> (i32, i32) {
    %c0_i32 = arith.constant 0 : i32
    %c0_i32_0 = arith.constant 0 : i32
    %c0_i32_1 = arith.constant 0 : i32
    return %c0_i32, %c0_i32_0 : i32, i32
  }
  func.func @transform_2(%arg0: i32, %arg1: i32, %arg2: memref<1xi32, #tpu.memory_space<smem>>) -> (i32, i32) {
    %c0_i32 = arith.constant 0 : i32
    %c0_i32_0 = arith.constant 0 : i32
    %c0_i32_1 = arith.constant 0 : i32
    return %c0_i32, %c0_i32_0 : i32, i32
  }
  func.func @transform_3(%arg0: i32, %arg1: i32, %arg2: memref<1xi32, #tpu.memory_space<smem>>) -> (i32, i32) {
    %c0_i32 = arith.constant 0 : i32
    %c0_i32_0 = arith.constant 0 : i32
    %c0_i32_1 = arith.constant 0 : i32
    return %c0_i32, %c0_i32_0 : i32, i32
  }
  func.func @transform_4(%arg0: i32, %arg1: i32, %arg2: memref<1xi32, #tpu.memory_space<smem>>) -> (i32, i32) {
    %c0_i32 = arith.constant 0 : i32
    %c0_i32_0 = arith.constant 0 : i32
    %c0_i32_1 = arith.constant 0 : i32
    return %c0_i32, %c0_i32_0 : i32, i32
  }
  func.func @transform_5(%arg0: i32, %arg1: i32, %arg2: memref<1xi32, #tpu.memory_space<smem>>) -> (i32, i32) {
    %c0_i32 = arith.constant 0 : i32
    %c0_i32_0 = arith.constant 0 : i32
    %c0_i32_1 = arith.constant 0 : i32
    return %c0_i32, %c0_i32_0 : i32, i32
  }
  func.func @transform_6(%arg0: i32, %arg1: i32, %arg2: memref<1xi32, #tpu.memory_space<smem>>) -> (i32, i32) {
    %c1_i32 = arith.constant 1 : i32
    %0 = arith.muli %arg0, %c1_i32 : i32
    %1 = arith.addi %0, %arg1 : i32
    %c0_i32 = arith.constant 0 : i32
    %c0_i32_0 = arith.constant 0 : i32
    return %c0_i32, %1 : i32, i32
  }
  func.func @transform_7(%arg0: i32, %arg1: i32, %arg2: memref<1xi32, #tpu.memory_space<smem>>) -> (i32, i32) {
    %c0_i32 = arith.constant 0 : i32
    %c0_i32_0 = arith.constant 0 : i32
    return %arg0, %c0_i32 : i32, i32
  }
  func.func @transform_8(%arg0: i32, %arg1: i32, %arg2: memref<1xi32, #tpu.memory_space<smem>>) -> (i32, i32) {
    %c0_i32 = arith.constant 0 : i32
    %c0_i32_0 = arith.constant 0 : i32
    return %arg0, %c0_i32 : i32, i32
  }
  func.func @transform_9(%arg0: i32, %arg1: i32, %arg2: memref<1xi32, #tpu.memory_space<smem>>) -> (i32, i32) {
    %c0_i32 = arith.constant 0 : i32
    %c0_i32_0 = arith.constant 0 : i32
    return %arg0, %c0_i32 : i32, i32
  }
}

</mosaic_0001>

<bundles_post_ra>
// kernel: tpu_custom_call.1
= control target key start
LH: loop header
LB: loop body
LE: loop exit
PB: predicated region body
PF: predicated region fallthrough
CT: control target
= control target key end

     0   :  { %s2186_s0 = inlined_call_operand.<no memory space> [shape: s32[1], index: 0, kind: input, shape index: {}]   ;;  %s2187_s1 = inlined_call_operand.vmem [shape: bf16[128,33], index: 1, kind: input, shape index: {}]   ;;  %s2188_s2 = inlined_call_operand.vmem [shape: bf16[33,512], index: 2, kind: input, shape index: {}]   ;;  %s2189_s3 = inlined_call_operand.hbm [shape: bf16[512,128], index: 3, kind: input, shape index: {}]   ;;  %s2190_s4 = inlined_call_operand.vmem [shape: f32[1,128], index: 4, kind: input, shape index: {}]   ;;  %s2191_s5 = inlined_call_operand.vmem [shape: bf16[1,128], index: 5, kind: input, shape index: {}]   ;;  %s2192_s6 = inlined_call_operand.<no memory space> [shape: f32[1,1], index: 6, kind: input, shape index: {}]   ;;  %s2193_s7 = inlined_call_operand.hbm [shape: f32[1,128], index: 7, kind: output, shape index: {0}]   ;;  %s2194_s8 = inlined_call_operand.hbm [shape: f32[1,128], index: 8, kind: output, shape index: {1}]   ;;  %s2195_s9 = inlined_call_operand.hbm [shape: f32[1,128], index: 9, kind: output, shape index: {2}]   ;;  %s2196_s10 = inlined_call_operand.hbm [shape: f32[1,512], index: 10, kind: output, shape index: {3}]  }
   0x1   :  { %v17_v0 = vstv %s2192_s6 }
   0x2   :  { %18 = vst [vmem:[#allocation7] sm:$0x1] %v17_v0 }
   0x3   :  { %19 = vsyncpa [#allocation9], 0 }
   0x4   :  { %20 = vsyncpa [#allocation10], 0 }
   0x5   :  { %21 = vsyncpa [#allocation13], 0 }
   0x6   :  { %22 = vsyncpa [#allocation16], 0  ;;  %s1811_s15 = smov [#allocation8]   ;;  %s1693_s19 = scalar_lea.hbm %s2189_s3, 4096 }
   0x7   :  { %s40_s16 = sshll.u32 %s1811_s15, 4  ;;  %p1694_p0 = scmp.ne.s32.totalorder %s2189_s3, %s1693_s19  ;;  %s41_s16 = int_to_ptr.vmem [resolvable:$true] %s40_s16 }
   0x8   :  { %p1697_p1 = scmp.lt.u32.totalorder %s1693_s19, %s2189_s3 }
   0xa   :  { %p1699_p2 = pnand %p1697_p1, %p1694_p0 }
   0xc   :  { %1702 = shalt.err (!%p1699_p2)
}
   0xd   :  { %s1703_s6 = scalar_lea.vmem %s41_s16, 4096  ;;  %p1708_p4 = scmp.lt.s32.totalorder %s41_s16, %s41_s16 }
   0xe   :  { %p1704_p3 = scmp.ne.s32.totalorder %s41_s16, %s1703_s6  ;;  %p1709_p5 = scmp.lt.s32.totalorder %s1703_s6, %s1703_s6 }
  0x10   :  { %p1710_p6 = por %p1709_p5, %p1708_p4 }
  0x12   :  { %p1711_p7 = pnand %p1710_p6, %p1704_p3 }
  0x14   :  { %1714 = shalt.err (!%p1711_p7)
}
  0x15   :  { %s1812_s24 = smov 64   ;;  %s1813_s25 = smov 4  }
  0x16   :  { %46 = dma.hbm_to_vmem [thread:$0]  %s2189_s3, 4096, %s41_s16, [#allocation9], %s1812_s24, %s1812_s24, %s1813_s25  }
  0x17   :  { %1803 = dma.done.wait [#allocation9], 4096  }
  0x18   :  { %1804 = vsyncadd [#allocation9], 4294963200  ;;  %v1814_v1 = vmov 0   ;;  %vm225_vm0 = vcmask 1040384   ;;  %v1601_v2 = vld [vmem:[%s2188_s2 + $0x4] ss:$16 sps:$4 sm:$0xff]  }
  0x19   :  { %272 = vmatprep.mubr.bf16.mxu0 %v1814_v1  ;;  %332 = vmatprep.mubr.bf16.mxu1 %v1814_v1  ;;  %v1603_v3 = vld [vmem:[%s2188_s2] ss:$16 sps:$4 sm:$0xff]   ;;  %v1604_v4 = vld [vmem:[%s2188_s2 + $0x24] ss:$16 sps:$4 sm:$0xff]   ;;  %v227_v6 = vsel %vm225_vm0, 65535, %v1814_v1  ;;  %vm200_vm1 = vcmask 269312  }
  0x1a   :  { %1599 = vset.pattern.permute.xlu0 %v1814_v1  ;;  %1600 = vset.pattern.permute.xlu1 %v1814_v1  ;;  %v108_v5 = vld [vmem:[%s2188_s2 + $0x40] sm:$0x11]  ;;  %v1613_v12 = vld [vmem:[%s2188_s2 + $0xc] ss:$16 sps:$4 sm:$0xff]   ;;  %v1926_v15 = vld [vmem:[%s2187_s1 + $0x30] sm:$0xff]   ;;  %vm1816_vm2 = vmmov 0  }
  0x1b   :  { %240 = vmatprep.subr.bf16.mxu0 %v1601_v2  ;;  %1581 = vmatprep.subr.bf16.mxu1 %v1601_v2  ;;  %v1606_v7 = vld [vmem:[%s2188_s2 + $0x20] ss:$16 sps:$4 sm:$0xff]   ;;  %v1372_v8 = vcombine.high %v108_v5, %v108_v5  ;;  %v1371_v9 = vcombine.low %v108_v5, %v108_v5  ;;  %v109_v14 = vld [vmem:[%s2188_s2 + $0x48] sm:$0x11]  ;;  %v1948_v23 = vld [vmem:[%s2187_s1 + $0x38] sm:$0xff]   ;;  %vm76_vm3 = vcmask 0  }
  0x1c   :  { %241 = vmatpush1.bf16.msra.mxu0 %v1603_v3  ;;  %1584 = vmatpush1.bf16.msra.mxu1 %v1603_v3  ;;  %v1609_v13 = vld [vmem:[%s2187_s1] sm:$0xff]   ;;  %v1611_v16 = vld [vmem:[%s2188_s2 + $0x8] ss:$16 sps:$4 sm:$0xff]   ;;  %v1616_v17 = vld [vmem:[%s2188_s2 + $0x2c] ss:$16 sps:$4 sm:$0xff]   ;;  %v1374_v18 = vcombine.high %v109_v14, %v109_v14  ;;  %v1373_v20 = vcombine.low %v109_v14, %v109_v14  ;;  %s1819_s6 = smov [#allocation11]  }
  0x1d   :  { %242 = vmatprep.subr.bf16.mxu0 %v1604_v4  ;;  %1582 = vmatprep.subr.bf16.mxu1 %v1604_v4  ;;  %v232_v10 = vand.u32 %v1372_v8, %v227_v6  ;;  %v229_v11 = vand.u32 %v1371_v9, %v227_v6  ;;  %v1614_v19 = vld [vmem:[%s2188_s2 + $0x28] ss:$16 sps:$4 sm:$0xff]   ;;  %v1633_v28 = vld [vmem:[#allocation8 + $0x48] sm:$0xff]   ;;  %v1639_v35 = vld [vmem:[#allocation8 + $0x58] sm:$0xff]   ;;  %s1299_s24 = sshll.u32 %s1819_s6, 4  ;;  %s1300_s24 = int_to_ptr.vmem [resolvable:$true] %s1299_s24 }
  0x1e   :  { %v1617_v21 = vld [vmem:[%s2187_s1 + $0x8] sm:$0xff]   ;;  %v238_v22 = vand.u32 %v1374_v18, %v227_v6  ;;  %v235_v25 = vand.u32 %v1373_v20, %v227_v6  ;;  %v1635_v30 = vld [vmem:[#allocation8 + $0x50] sm:$0xff]   ;;  %v1640_v39 = vld [vmem:[#allocation8 + $0x18] sm:$0xff]  }
  0x1f   :  { %v1629_v24 = vld [vmem:[#allocation8 + $0x40] sm:$0xff]   ;;  %v1634_v29 = vld [vmem:[#allocation8 + $0x8] sm:$0xff]   ;;  %v1637_v34 = vld [vmem:[#allocation8 + $0x10] sm:$0xff]  }
  0x20   :  { %243 = vmatpush1.bf16.msra.mxu0 %v1606_v7  ;;  %1585 = vmatpush1.bf16.msra.mxu1 %v1606_v7  ;;  %v1630_v26 = vld [vmem:[#allocation8] sm:$0xff]   ;;  %v1621_v31 = vld [vmem:[%s2187_s1 + $0x10] sm:$0xff]   ;;  %v1622_v38 = vld [vmem:[%s2187_s1 + $0x18] sm:$0xff]  }
  0x21   :  { %244 = vmatprep.subr.bf16.mxu0 %v232_v10  ;;  %1583 = vmatprep.subr.bf16.mxu1 %v232_v10  ;;  %v1625_v27 = vld [vmem:[#allocation8 + $0xc0] sm:$0xff]   ;;  %v1627_v33 = vld [vmem:[#allocation8 + $0xc8] sm:$0xff]   ;;  %v1631_v37 = vld [vmem:[#allocation8 + $0xd0] sm:$0xff]  }
  0x22   :  { %v1626_v32 = vld [vmem:[#allocation8 + $0x80] sm:$0xff]   ;;  %v1628_v36 = vld [vmem:[#allocation8 + $0x88] sm:$0xff]   ;;  %v1632_v41 = vld [vmem:[#allocation8 + $0x90] sm:$0xff]  }
  0x23   :  { %v1641_v40 = vld [vmem:[#allocation8 + $0x60] sm:$0xff]   ;;  %v1636_v43 = vld [vmem:[#allocation8 + $0xd8] sm:$0xff]   ;;  %v1645_v44 = vld [vmem:[#allocation8 + $0x68] sm:$0xff]  }
  0x24   :  { %245 = vmatpush1.bf16.msra.mxu0 %v229_v11  ;;  %1586 = vmatpush1.bf16.msra.mxu1 %v229_v11  ;;  %v1643_v42 = vld [vmem:[#allocation8 + $0x20] sm:$0xff]   ;;  %v1638_v45 = vld [vmem:[#allocation8 + $0x98] sm:$0xff]   ;;  %v1646_v46 = vld [vmem:[#allocation8 + $0x28] sm:$0xff]  }
  0x25   :  { %353 = vmatprep.subr.bf16.mxu1 %v1613_v12  ;;  %1424 = vmatprep.subr.bf16.mxu0 %v1629_v24  ;;  %v1642_v47 = vld [vmem:[#allocation8 + $0xe0] sm:$0xff]   ;;  %v1647_v51 = vld [vmem:[#allocation8 + $0x70] sm:$0xff]   ;;  %v1648_v53 = vld [vmem:[#allocation8 + $0xe8] sm:$0xff]  }
  0x26   :  { %v1623_v48 = vld [vmem:[%s2187_s1 + $0x20] sm:$0xff]   ;;  %v1624_v50 = vld [vmem:[%s2187_s1 + $0x28] sm:$0xff]   ;;  %v1649_v52 = vld [vmem:[#allocation8 + $0x30] sm:$0xff]  }
  0x27   :  { %1375 = vmatmul.mubr.msk.bf16.vlgmr.msra.gmra.mrb[0].mxu0 %vm200_vm1, %v1609_v13  ;;  %1381 = vmatmul.mubr.msk.bf16.vlgmr.msra.gmra.mrb[0].mxu1 %vm200_vm1, %v1926_v15  ;;  %v1644_v49 = vld [vmem:[#allocation8 + $0xa0] sm:$0xff]   ;;  %v1651_v54 = vld [vmem:[#allocation8 + $0x78] sm:$0xff]   ;;  %v1650_v56 = vld [vmem:[#allocation8 + $0xa8] sm:$0xff]  }
  0x28   :  { %354 = vmatpush1.bf16.msra.mxu1 %v1611_v16  ;;  %282 = vmatprep.mubr.bf16.mxu0 %v1814_v1  ;;  %v1652_v55 = vld [vmem:[#allocation8 + $0x38] sm:$0xff]   ;;  %v1653_v57 = vld [vmem:[#allocation8 + $0xf0] sm:$0xff]  }
  0x29   :  { %355 = vmatprep.subr.bf16.mxu1 %v1616_v17  ;;  %342 = vmatprep.mubr.bf16.mxu1 %v1814_v1  ;;  %v1654_v58 = vld [vmem:[#allocation8 + $0xb0] sm:$0xff]   ;;  %v1655_v59 = vld [vmem:[#allocation8 + $0xf8] sm:$0xff]  }
  0x2a   :  { %1425 = vmatpush3.bf16.msra.mxu0 %v1630_v26  ;;  %v1656_v60 = vld [vmem:[#allocation8 + $0xb8] sm:$0xff]  }
  0x2b   :  { %1426 = vmatprep.subr.bf16.mxu0 %v1633_v28 }
  0x2c   :  { %356 = vmatpush1.bf16.msra.mxu1 %v1614_v19 }
  0x2d   :  { %357 = vmatprep.subr.bf16.mxu1 %v238_v22 }
  0x2e   :  { %1427 = vmatpush3.bf16.msra.mxu0 %v1634_v29 }
  0x2f   :  { %1376 = vmatmul.mubr.msk.bf16.gmra.mrb[4].mxu0 %vm200_vm1, %v1617_v21  ;;  %1382 = vmatmul.mubr.msk.bf16.gmra.mrb[4].mxu1 %vm200_vm1, %v1948_v23 }
  0x30   :  { %358 = vmatpush1.bf16.msra.mxu1 %v235_v25  ;;  %292 = vmatprep.mubr.bf16.mxu0 %v1814_v1 }
  0x31   :  { %385 = vmatprep.mubr.bf16.mxu1 %v1814_v1  ;;  %1488 = vmatprep.subr.bf16.mxu1 %v1625_v27 }
  0x32   :  { %1428 = vmatprep.subr.bf16.mxu0 %v1635_v30 }
  0x33   :  { %1429 = vmatpush3.bf16.msra.mxu0 %v1637_v34 }
  0x34   :  { %1430 = vmatprep.subr.bf16.mxu0 %v1639_v35 }
  0x37   :  { %1377 = vmatmul.mubr.msk.bf16.gmra.mrb[8].mxu0 %vm200_vm1, %v1621_v31  ;;  %1383 = vmatmul.mubr.msk.bf16.vlgmr.msra.gmra.mrb[8].mxu1 %vm200_vm1, %v1609_v13 }
  0x38   :  { %302 = vmatprep.mubr.bf16.mxu0 %v1814_v1  ;;  %395 = vmatprep.mubr.bf16.mxu1 %v1814_v1 }
  0x39   :  { %1489 = vmatpush3.bf16.msra.mxu1 %v1626_v32  ;;  %1431 = vmatpush3.bf16.msra.mxu0 %v1640_v39 }
  0x3a   :  { %1490 = vmatprep.subr.bf16.mxu1 %v1627_v33  ;;  %1432 = vmatprep.subr.bf16.mxu0 %v1641_v40 }
  0x3d   :  { %1491 = vmatpush3.bf16.msra.mxu1 %v1628_v36  ;;  %1433 = vmatpush3.bf16.msra.mxu0 %v1643_v42 }
  0x3e   :  { %1492 = vmatprep.subr.bf16.mxu1 %v1631_v37  ;;  %1434 = vmatprep.subr.bf16.mxu0 %v1645_v44 }
  0x3f   :  { %1378 = vmatmul.mubr.msk.bf16.gmra.mrb[12].mxu0 %vm200_vm1, %v1622_v38  ;;  %1384 = vmatmul.mubr.msk.bf16.gmra.mrb[12].mxu1 %vm200_vm1, %v1617_v21 }
  0x40   :  { %312 = vmatprep.mubr.bf16.mxu0 %v1814_v1  ;;  %405 = vmatprep.mubr.bf16.mxu1 %v1814_v1 }
  0x41   :  { %1493 = vmatpush3.bf16.msra.mxu1 %v1632_v41  ;;  %1435 = vmatpush3.bf16.msra.mxu0 %v1646_v46 }
  0x42   :  { %1494 = vmatprep.subr.bf16.mxu1 %v1636_v43  ;;  %1436 = vmatprep.subr.bf16.mxu0 %v1647_v51 }
  0x45   :  { %1495 = vmatpush3.bf16.msra.mxu1 %v1638_v45  ;;  %1437 = vmatpush3.bf16.msra.mxu0 %v1649_v52 }
  0x46   :  { %1496 = vmatprep.subr.bf16.mxu1 %v1642_v47  ;;  %1438 = vmatprep.subr.bf16.mxu0 %v1651_v54 }
  0x47   :  { %1379 = vmatmul.mubr.msk.bf16.gmra.mrb[16].mxu0 %vm200_vm1, %v1623_v48  ;;  %1385 = vmatmul.mubr.msk.bf16.gmra.mrb[16].mxu1 %vm200_vm1, %v1621_v31 }
  0x48   :  { %322 = vmatprep.mubr.bf16.mxu0 %v1814_v1  ;;  %415 = vmatprep.mubr.bf16.mxu1 %v1814_v1 }
  0x49   :  { %1497 = vmatpush3.bf16.msra.mxu1 %v1644_v49  ;;  %1439 = vmatpush3.bf16.msra.mxu0 %v1652_v55 }
  0x4a   :  { %1498 = vmatprep.subr.bf16.mxu1 %v1648_v53 }
  0x4d   :  { %1499 = vmatpush3.bf16.msra.mxu1 %v1650_v56 }
  0x4e   :  { %1500 = vmatprep.subr.bf16.mxu1 %v1653_v57 }
  0x4f   :  { %1380 = vmatmul.mubr.msk.bf16.gmra.mrb[20].mxu0 %vm200_vm1, %v1624_v50  ;;  %1386 = vmatmul.mubr.msk.bf16.gmra.mrb[20].mxu1 %vm200_vm1, %v1622_v38 }
  0x50   :  { %425 = vmatprep.mubr.bf16.mxu1 %v1814_v1 }
  0x51   :  { %1501 = vmatpush3.bf16.msra.mxu1 %v1654_v58 }
  0x52   :  { %1502 = vmatprep.subr.bf16.mxu1 %v1655_v59 }
  0x55   :  { %1503 = vmatpush3.bf16.msra.mxu1 %v1656_v60 }
  0x57   :  { %1387 = vmatmul.mubr.msk.bf16.gmra.mrb[24].mxu1 %vm200_vm1, %v1623_v48 }
  0x58   :  { %435 = vmatprep.mubr.bf16.mxu1 %v1814_v1 }
  0x5f   :  { %1388 = vmatmul.mubr.msk.bf16.gmra.mrb[28].mxu1 %vm200_vm1, %v1624_v50 }
  0x60   :  { %445 = vmatprep.mubr.bf16.mxu1 %v1814_v1 }
  0x67   :  { %1389 = vmatmul.mubr.msk.bf16.gmra.mrb[32].mxu1 %vm200_vm1, %v1926_v15 }
  0x68   :  { %455 = vmatprep.mubr.bf16.mxu1 %v1814_v1 }
  0x6f   :  { %1390 = vmatmul.mubr.msk.bf16.gmra.mrb[36].mxu1 %vm200_vm1, %v1948_v23 }
  0xfa   :  { %v274_v61 = vpop.f32.mrb[0].mxu0  ;;  %v334_v62 = vpop.f32.mrb[0].mxu1 }
  0xfb   :  { %v466_v63 = vmax.f32 %v274_v61, 0.0  ;;  %v276_v0 = vpop.f32.mrb[1].mxu0  ;;  %v336_v2 = vpop.f32.mrb[1].mxu1  ;;  %v514_v6 = vmax.f32 %v334_v62, 0.0 }
  0xfc   :  { %v467_v3 = vmax.f32 %v276_v0, 0.0  ;;  %v278_v4 = vpop.f32.mrb[2].mxu0  ;;  %v338_v5 = vpop.f32.mrb[2].mxu1  ;;  %v515_v11 = vmax.f32 %v336_v2, 0.0 }
  0xfd   :  { %v470_v7 = vmax.f32 %v278_v4, 0.0  ;;  %v518_v8 = vmax.f32 %v338_v5, 0.0  ;;  %v280_v9 = vpop.f32.mrb[3].mxu0  ;;  %v340_v10 = vpop.f32.mrb[3].mxu1 }
  0xfe   :  { %v471_v12 = vmax.f32 %v280_v9, 0.0  ;;  %v519_v13 = vmax.f32 %v340_v10, 0.0 }
  0xff   :  { %v530_v14 = vpack.c.bf16 %v470_v7, %v466_v63  ;;  %v1991_v15 = vpack.c.bf16 %v518_v8, %v514_v6 }
 0x100   :  { %v531_v16 = vpack.c.bf16 %v471_v12, %v467_v3  ;;  %v1993_v17 = vpack.c.bf16 %v519_v13, %v515_v11 }
 0x102   :  { %v284_v18 = vpop.f32.mrb[4].mxu0  ;;  %v344_v19 = vpop.f32.mrb[4].mxu1  ;;  %857 = vmatprep.mubr.bf16.mxu0 %v531_v16  ;;  %1145 = vmatprep.subr.bf16.mxu1 %v531_v16 }
 0x103   :  { %v474_v20 = vmax.f32 %v284_v18, 0.0  ;;  %v286_v21 = vpop.f32.mrb[5].mxu0  ;;  %v346_v22 = vpop.f32.mrb[5].mxu1  ;;  %858 = vmatmul.mubr.bf16.vlgmr.msra.gmra.mrb[24].mxu0 %v530_v14  ;;  %v522_v26 = vmax.f32 %v344_v19, 0.0 }
 0x104   :  { %v475_v23 = vmax.f32 %v286_v21, 0.0  ;;  %v288_v24 = vpop.f32.mrb[6].mxu0  ;;  %v348_v25 = vpop.f32.mrb[6].mxu1  ;;  %v523_v31 = vmax.f32 %v346_v22, 0.0 }
 0x105   :  { %v478_v27 = vmax.f32 %v288_v24, 0.0  ;;  %v526_v28 = vmax.f32 %v348_v25, 0.0  ;;  %v290_v29 = vpop.f32.mrb[7].mxu0  ;;  %v350_v30 = vpop.f32.mrb[7].mxu1 }
 0x106   :  { %v479_v32 = vmax.f32 %v290_v29, 0.0  ;;  %v527_v33 = vmax.f32 %v350_v30, 0.0 }
 0x107   :  { %v534_v34 = vpack.c.bf16 %v478_v27, %v474_v20  ;;  %v1995_v35 = vpack.c.bf16 %v526_v28, %v522_v26 }
 0x108   :  { %v535_v36 = vpack.c.bf16 %v479_v32, %v475_v23  ;;  %v1997_v37 = vpack.c.bf16 %v527_v33, %v523_v31 }
 0x10a   :  { %v294_v38 = vpop.f32.mrb[8].mxu0  ;;  %v387_v39 = vpop.f32.mrb[8].mxu1  ;;  %865 = vmatprep.mubr.bf16.mxu0 %v535_v36 }
 0x10b   :  { %v482_v40 = vmax.f32 %v294_v38, 0.0  ;;  %v296_v41 = vpop.f32.mrb[9].mxu0  ;;  %v389_v42 = vpop.f32.mrb[9].mxu1  ;;  %866 = vmatmul.mubr.bf16.gmra.mrb[28].mxu0 %v534_v34  ;;  %v468_v46 = vmax.f32 %v387_v39, 0.0 }
 0x10c   :  { %v483_v43 = vmax.f32 %v296_v41, 0.0  ;;  %v298_v44 = vpop.f32.mrb[10].mxu0  ;;  %v391_v45 = vpop.f32.mrb[10].mxu1  ;;  %v469_v51 = vmax.f32 %v389_v42, 0.0 }
 0x10d   :  { %v486_v47 = vmax.f32 %v298_v44, 0.0  ;;  %v472_v48 = vmax.f32 %v391_v45, 0.0  ;;  %v300_v49 = vpop.f32.mrb[11].mxu0  ;;  %v393_v50 = vpop.f32.mrb[11].mxu1 }
 0x10e   :  { %v487_v52 = vmax.f32 %v300_v49, 0.0  ;;  %v473_v53 = vmax.f32 %v393_v50, 0.0 }
 0x10f   :  { %v538_v54 = vpack.c.bf16 %v486_v47, %v482_v40  ;;  %v1999_v55 = vpack.c.bf16 %v472_v48, %v468_v46 }
 0x110   :  { %v539_v56 = vpack.c.bf16 %v487_v52, %v483_v43  ;;  %v2001_v57 = vpack.c.bf16 %v473_v53, %v469_v51 }
 0x112   :  { %v304_v58 = vpop.f32.mrb[12].mxu0  ;;  %v397_v59 = vpop.f32.mrb[12].mxu1  ;;  %873 = vmatprep.mubr.bf16.mxu0 %v539_v56  ;;  %954 = vmatprep.mubr.bf16.mxu1 %v2001_v57 }
 0x113   :  { %v490_v60 = vmax.f32 %v304_v58, 0.0  ;;  %v306_v61 = vpop.f32.mrb[13].mxu0  ;;  %v399_v62 = vpop.f32.mrb[13].mxu1  ;;  %874 = vmatmul.mubr.bf16.gmra.mrb[32].mxu0 %v538_v54  ;;  %955 = vmatmul.mubr.bf16.vlgmr.msra.gmra.mrb[40].mxu1 %v1999_v55  ;;  %v476_v3 = vmax.f32 %v397_v59, 0.0 }
 0x114   :  { %v491_v63 = vmax.f32 %v306_v61, 0.0  ;;  %1146 = vmatpush1.bf16.msra.mxu1 %v530_v14  ;;  %v308_v0 = vpop.f32.mrb[14].mxu0  ;;  %v401_v2 = vpop.f32.mrb[14].mxu1  ;;  %v477_v8 = vmax.f32 %v399_v62, 0.0 }
 0x115   :  { %v494_v4 = vmax.f32 %v308_v0, 0.0  ;;  %v480_v5 = vmax.f32 %v401_v2, 0.0  ;;  %v310_v6 = vpop.f32.mrb[15].mxu0  ;;  %v403_v7 = vpop.f32.mrb[15].mxu1  ;;  %1147 = vmatprep.subr.bf16.mxu1 %v535_v36 }
 0x116   :  { %v495_v9 = vmax.f32 %v310_v6, 0.0  ;;  %v481_v10 = vmax.f32 %v403_v7, 0.0 }
 0x117   :  { %v542_v11 = vpack.c.bf16 %v494_v4, %v490_v60  ;;  %v2005_v12 = vpack.c.bf16 %v480_v5, %v476_v3 }
 0x118   :  { %v543_v13 = vpack.c.bf16 %v495_v9, %v491_v63  ;;  %v2007_v16 = vpack.c.bf16 %v481_v10, %v477_v8  ;;  %1148 = vmatpush1.bf16.msra.mxu1 %v534_v34 }
 0x119   :  { %1149 = vmatprep.subr.bf16.mxu1 %v539_v56 }
 0x11a   :  { %v314_v14 = vpop.f32.mrb[16].mxu0  ;;  %v407_v18 = vpop.f32.mrb[16].mxu1  ;;  %881 = vmatprep.mubr.bf16.mxu0 %v543_v13  ;;  %962 = vmatprep.mubr.bf16.mxu1 %v2007_v16 }
 0x11b   :  { %v498_v19 = vmax.f32 %v314_v14, 0.0  ;;  %v316_v20 = vpop.f32.mrb[17].mxu0  ;;  %v409_v21 = vpop.f32.mrb[17].mxu1  ;;  %882 = vmatmul.mubr.bf16.gmra.mrb[36].mxu0 %v542_v11  ;;  %963 = vmatmul.mubr.bf16.gmra.mrb[44].mxu1 %v2005_v12  ;;  %v484_v25 = vmax.f32 %v407_v18, 0.0 }
 0x11c   :  { %v499_v22 = vmax.f32 %v316_v20, 0.0  ;;  %v318_v23 = vpop.f32.mrb[18].mxu0  ;;  %v411_v24 = vpop.f32.mrb[18].mxu1  ;;  %1150 = vmatpush1.bf16.msra.mxu1 %v538_v54  ;;  %v485_v30 = vmax.f32 %v409_v21, 0.0 }
 0x11d   :  { %v502_v26 = vmax.f32 %v318_v23, 0.0  ;;  %v488_v27 = vmax.f32 %v411_v24, 0.0  ;;  %v320_v28 = vpop.f32.mrb[19].mxu0  ;;  %v413_v29 = vpop.f32.mrb[19].mxu1  ;;  %1151 = vmatprep.subr.bf16.mxu1 %v543_v13 }
 0x11e   :  { %v503_v31 = vmax.f32 %v320_v28, 0.0  ;;  %v489_v32 = vmax.f32 %v413_v29, 0.0 }
 0x11f   :  { %v546_v33 = vpack.c.bf16 %v502_v26, %v498_v19  ;;  %v2011_v34 = vpack.c.bf16 %v488_v27, %v484_v25 }
 0x120   :  { %v547_v36 = vpack.c.bf16 %v503_v31, %v499_v22  ;;  %v2013_v38 = vpack.c.bf16 %v489_v32, %v485_v30  ;;  %1152 = vmatpush1.bf16.msra.mxu1 %v542_v11 }
 0x122   :  { %v324_v39 = vpop.f32.mrb[20].mxu0  ;;  %v417_v40 = vpop.f32.mrb[20].mxu1  ;;  %889 = vmatprep.mubr.bf16.mxu0 %v547_v36  ;;  %970 = vmatprep.mubr.bf16.mxu1 %v2013_v38 }
 0x123   :  { %v506_v41 = vmax.f32 %v324_v39, 0.0  ;;  %v326_v42 = vpop.f32.mrb[21].mxu0  ;;  %v419_v43 = vpop.f32.mrb[21].mxu1  ;;  %890 = vmatmul.mubr.bf16.gmra.mrb[40].mxu0 %v546_v33  ;;  %971 = vmatmul.mubr.bf16.gmra.mrb[48].mxu1 %v2011_v34  ;;  %v492_v47 = vmax.f32 %v417_v40, 0.0 }
 0x124   :  { %v507_v44 = vmax.f32 %v326_v42, 0.0  ;;  %v328_v45 = vpop.f32.mrb[22].mxu0  ;;  %v421_v46 = vpop.f32.mrb[22].mxu1  ;;  %1153 = vmatprep.subr.bf16.mxu1 %v547_v36  ;;  %v493_v52 = vmax.f32 %v419_v43, 0.0  ;;  %v1815_v42 = vmov 0.0  }
 0x125   :  { %v510_v48 = vmax.f32 %v328_v45, 0.0  ;;  %v496_v49 = vmax.f32 %v421_v46, 0.0  ;;  %v330_v50 = vpop.f32.mrb[23].mxu0  ;;  %v423_v51 = vpop.f32.mrb[23].mxu1  ;;  %1154 = vmatpush1.bf16.msra.mxu1 %v546_v33  ;;  %1561 = vmatprep.subr.bf16.mxu0 %v1815_v42  ;;  %78 = vst.msk [vmem:[#allocation3] sm:$0x1] %vm76_vm3, %v1815_v42 }
 0x126   :  { %v511_v53 = vmax.f32 %v330_v50, 0.0  ;;  %v497_v54 = vmax.f32 %v423_v51, 0.0 }
 0x127   :  { %v550_v56 = vpack.c.bf16 %v510_v48, %v506_v41  ;;  %v2017_v58 = vpack.c.bf16 %v496_v49, %v492_v47  ;;  %v1044_v47 = vld [vmem:[#allocation7] sm:$0x1] }
 0x128   :  { %v551_v59 = vpack.c.bf16 %v511_v53, %v507_v44  ;;  %v2019_v60 = vpack.c.bf16 %v497_v54, %v493_v52  ;;  %1047 = vperm.xlu0 %1599, %v1044_v47  }
 0x12a   :  { %v427_v61 = vpop.f32.mrb[24].mxu1  ;;  %897 = vmatprep.mubr.bf16.mxu0 %v551_v59  ;;  %978 = vmatprep.mubr.bf16.mxu1 %v2019_v60 }
 0x12b   :  { %1155 = vmatprep.subr.bf16.mxu1 %v551_v59  ;;  %v429_v62 = vpop.f32.mrb[25].mxu1  ;;  %898 = vmatmul.mubr.bf16.gmra.mrb[44].mxu0 %v550_v56  ;;  %v500_v0 = vmax.f32 %v427_v61, 0.0  ;;  %v2061_v59 = vld [vmem:[%s2190_s4] ss:$0 sm:$0xff] }
 0x12c   :  { %979 = vmatmul.mubr.bf16.gmra.mrb[52].mxu1 %v2017_v58  ;;  %v431_v63 = vpop.f32.mrb[26].mxu1  ;;  %905 = vmatprep.mubr.bf16.mxu0 %v1993_v17  ;;  %v501_v4 = vmax.f32 %v429_v62, 0.0 }
 0x12d   :  { %1156 = vmatpush1.bf16.msra.mxu1 %v550_v56  ;;  %v504_v2 = vmax.f32 %v431_v63, 0.0  ;;  %v433_v3 = vpop.f32.mrb[27].mxu1 }
 0x12e   :  { %1157 = vmatprep.subr.bf16.mxu1 %v1993_v17  ;;  %v505_v5 = vmax.f32 %v433_v3, 0.0 }
 0x12f   :  { %v2025_v6 = vpack.c.bf16 %v504_v2, %v500_v0 }
 0x130   :  { %v2027_v7 = vpack.c.bf16 %v505_v5, %v501_v4 }
 0x131   :  { %1158 = vmatpush1.bf16.msra.mxu1 %v1991_v15 }
 0x132   :  { %1159 = vmatprep.subr.bf16.mxu1 %v1997_v37  ;;  %v437_v8 = vpop.f32.mrb[28].mxu1  ;;  %986 = vmatprep.mubr.bf16.mxu1 %v2027_v7 }
 0x133   :  { %v439_v9 = vpop.f32.mrb[29].mxu1  ;;  %906 = vmatmul.mubr.bf16.gmra.mrb[48].mxu0 %v1991_v15  ;;  %v508_v17 = vmax.f32 %v437_v8, 0.0 }
 0x134   :  { %987 = vmatmul.mubr.bf16.gmra.mrb[56].mxu1 %v2025_v6  ;;  %v441_v10 = vpop.f32.mrb[30].mxu1  ;;  %913 = vmatprep.mubr.bf16.mxu0 %v1997_v37  ;;  %v509_v14 = vmax.f32 %v439_v9, 0.0 }
 0x135   :  { %1160 = vmatpush1.bf16.msra.mxu1 %v1995_v35  ;;  %v512_v11 = vmax.f32 %v441_v10, 0.0  ;;  %v443_v13 = vpop.f32.mrb[31].mxu1 }
 0x136   :  { %v513_v18 = vmax.f32 %v443_v13, 0.0 }
 0x137   :  { %v2036_v19 = vpack.c.bf16 %v512_v11, %v508_v17 }
 0x138   :  { %v2038_v20 = vpack.c.bf16 %v513_v18, %v509_v14 }
 0x13a   :  { %v447_v21 = vpop.f32.mrb[32].mxu1  ;;  %994 = vmatprep.mubr.bf16.mxu1 %v2038_v20 }
 0x13b   :  { %v449_v15 = vpop.f32.mrb[33].mxu1  ;;  %914 = vmatmul.mubr.bf16.gmra.mrb[52].mxu0 %v1995_v35  ;;  %v516_v22 = vmax.f32 %v447_v21, 0.0 }
 0x13c   :  { %995 = vmatmul.mubr.bf16.gmra.mrb[60].mxu1 %v2036_v19  ;;  %v451_v37 = vpop.f32.mrb[34].mxu1  ;;  %v517_v25 = vmax.f32 %v449_v15, 0.0  ;;  %1577 = vmatprep.mubr.msk.bf16.mxu0 %vm1816_vm2, %v1815_v42 }
 0x13d   :  { %v520_v23 = vmax.f32 %v451_v37, 0.0  ;;  %v453_v24 = vpop.f32.mrb[35].mxu1 }
 0x13e   :  { %v521_v26 = vmax.f32 %v453_v24, 0.0 }
 0x13f   :  { %v2043_v27 = vpack.c.bf16 %v520_v23, %v516_v22 }
 0x140   :  { %v2045_v28 = vpack.c.bf16 %v521_v26, %v517_v25 }
 0x142   :  { %v457_v29 = vpop.f32.mrb[36].mxu1  ;;  %1002 = vmatprep.mubr.bf16.mxu1 %v2045_v28 }
 0x143   :  { %v459_v30 = vpop.f32.mrb[37].mxu1  ;;  %v524_v35 = vmax.f32 %v457_v29, 0.0 }
 0x144   :  { %1003 = vmatmul.mubr.bf16.gmra.mrb[64].mxu1 %v2043_v27  ;;  %v461_v31 = vpop.f32.mrb[38].mxu1  ;;  %v525_v36 = vmax.f32 %v459_v30, 0.0 }
 0x145   :  { %v528_v32 = vmax.f32 %v461_v31, 0.0  ;;  %v463_v33 = vpop.f32.mrb[39].mxu1 }
 0x146   :  { %v529_v39 = vmax.f32 %v463_v33, 0.0 }
 0x147   :  { %v2049_v40 = vpack.c.bf16 %v528_v32, %v524_v35 }
 0x148   :  { %v2051_v41 = vpack.c.bf16 %v529_v39, %v525_v36 }
 0x14a   :  { %1010 = vmatprep.mubr.bf16.mxu1 %v2051_v41 }
 0x14c   :  { %1011 = vmatmul.mubr.bf16.gmra.mrb[68].mxu1 %v2049_v40 }
 0x14d   :  { %1177 = vmatprep.mubr.bf16.mxu1 %v1814_v1 }
 0x1d6   :  { %v1440_v43 = vpop.f32.mrb[24].mxu0 }
 0x1d7   :  { %v1441_v44 = vpop.f32.mrb[25].mxu0 }
 0x1d8   :  { %v1442_v45 = vadd.f32 %v1441_v44, %v1440_v43  ;;  %v1443_v46 = vpop.f32.mrb[26].mxu0 }
 0x1d9   :  { %v1444_v48 = vpop.f32.mrb[27].mxu0 }
 0x1da   :  { %v1445_v49 = vadd.f32 %v1444_v48, %v1443_v46  ;;  %v860_v2 = vadd.f32 %v1442_v45, %v2061_v59 }
 0x1dc   :  { %v863_v17 = vadd.f32 %v1445_v49, %v2061_v59 }
 0x1de   :  { %v1446_v50 = vpop.f32.mrb[28].mxu0 }
 0x1df   :  { %v1447_v51 = vpop.f32.mrb[29].mxu0 }
 0x1e0   :  { %v1448_v52 = vadd.f32 %v1447_v51, %v1446_v50  ;;  %v1449_v53 = vpop.f32.mrb[30].mxu0 }
 0x1e1   :  { %v1450_v54 = vpop.f32.mrb[31].mxu0 }
 0x1e2   :  { %v1451_v56 = vadd.f32 %v1450_v54, %v1449_v53  ;;  %v868_v23 = vadd.f32 %v1448_v52, %v2061_v59 }
 0x1e4   :  { %v871_v35 = vadd.f32 %v1451_v56, %v2061_v59 }
 0x1e6   :  { %v1504_v61 = vpop.f32.mrb[40].mxu1  ;;  %v1452_v62 = vpop.f32.mrb[32].mxu0 }
 0x1e7   :  { %v1505_v63 = vpop.f32.mrb[41].mxu1  ;;  %v1453_v0 = vpop.f32.mrb[33].mxu0 }
 0x1e8   :  { %v1506_v3 = vadd.f32 %v1505_v63, %v1504_v61  ;;  %v1507_v4 = vpop.f32.mrb[42].mxu1  ;;  %v1454_v5 = vadd.f32 %v1453_v0, %v1452_v62  ;;  %v1455_v8 = vpop.f32.mrb[34].mxu0 }
 0x1e9   :  { %v1508_v9 = vpop.f32.mrb[43].mxu1  ;;  %v1456_v10 = vpop.f32.mrb[35].mxu0 }
 0x1ea   :  { %v957_v11 = vadd.f32 %v1506_v3, %v860_v2  ;;  %v1509_v13 = vadd.f32 %v1508_v9, %v1507_v4  ;;  %v1457_v14 = vadd.f32 %v1456_v10, %v1455_v8  ;;  %v876_v49 = vadd.f32 %v1454_v5, %v2061_v59 }
 0x1ec   :  { %v960_v18 = vadd.f32 %v1509_v13, %v863_v17  ;;  %1657 = vtanh.f32 %v957_v11  ;;  %v879_v62 = vadd.f32 %v1457_v14, %v2061_v59 }
 0x1ee   :  { %1659 = vtanh.f32 %v960_v18  ;;  %v1510_v21 = vpop.f32.mrb[44].mxu1  ;;  %v1458_v15 = vpop.f32.mrb[36].mxu0 }
 0x1ef   :  { %v1511_v37 = vpop.f32.mrb[45].mxu1  ;;  %v1459_v22 = vpop.f32.mrb[37].mxu0 }
 0x1f0   :  { %v1512_v24 = vadd.f32 %v1511_v37, %v1510_v21  ;;  %v1513_v25 = vpop.f32.mrb[46].mxu1  ;;  %v1460_v26 = vadd.f32 %v1459_v22, %v1458_v15  ;;  %v1461_v29 = vpop.f32.mrb[38].mxu0 }
 0x1f1   :  { %v1514_v30 = vpop.f32.mrb[47].mxu1  ;;  %v1462_v31 = vpop.f32.mrb[39].mxu0 }
 0x1f2   :  { %v965_v32 = vadd.f32 %v1512_v24, %v868_v23  ;;  %v1515_v33 = vadd.f32 %v1514_v30, %v1513_v25  ;;  %v1463_v36 = vadd.f32 %v1462_v31, %v1461_v29  ;;  %v884_v18 = vadd.f32 %v1460_v26, %v2061_v59 }
 0x1f4   :  { %v968_v39 = vadd.f32 %v1515_v33, %v871_v35  ;;  %1661 = vtanh.f32 %v965_v32  ;;  %v887_v24 = vadd.f32 %v1463_v36, %v2061_v59 }
 0x1f6   :  { %1663 = vtanh.f32 %v968_v39  ;;  %v1516_v43 = vpop.f32.mrb[48].mxu1  ;;  %v1464_v44 = vpop.f32.mrb[40].mxu0 }
 0x1f7   :  { %v1658_v45 = vpop.eup %1657  ;;  %v1517_v46 = vpop.f32.mrb[49].mxu1 }
 0x1f8   :  { %v1465_v47 = vpop.f32.mrb[41].mxu0  ;;  %v1660_v48 = vpop.eup %1659  ;;  %v1518_v50 = vadd.f32 %v1517_v46, %v1516_v43 }
 0x1f9   :  { %v1519_v51 = vpop.f32.mrb[50].mxu1  ;;  %v1466_v52 = vadd.f32 %v1465_v47, %v1464_v44  ;;  %v1467_v53 = vpop.f32.mrb[42].mxu0  ;;  %v1036_v56 = vpack.c.bf16 %v1660_v48, %v1658_v45 }
 0x1fa   :  { %v1520_v54 = vpop.f32.mrb[51].mxu1  ;;  %v1468_v61 = vpop.f32.mrb[43].mxu0  ;;  %v973_v63 = vadd.f32 %v1518_v50, %v876_v49 }
 0x1fb   :  { %v1521_v0 = vadd.f32 %v1520_v54, %v1519_v51  ;;  %v1469_v2 = vadd.f32 %v1468_v61, %v1467_v53  ;;  %1562 = vmatpush3.bf16.xpose.msra.mxu0 %v1036_v56  ;;  %v892_v45 = vadd.f32 %v1466_v52, %v2061_v59 }
 0x1fc   :  { %1563 = vmatprep.subr.bf16.mxu0 %v1815_v42  ;;  %1665 = vtanh.f32 %v973_v63 }
 0x1fd   :  { %v976_v3 = vadd.f32 %v1521_v0, %v879_v62  ;;  %v895_v51 = vadd.f32 %v1469_v2, %v2061_v59 }
 0x1fe   :  { %v1470_v4 = vpop.f32.mrb[44].mxu0  ;;  %v1662_v5 = vpop.eup %1661 }
 0x1ff   :  { %1667 = vtanh.f32 %v976_v3  ;;  %v1522_v8 = vpop.f32.mrb[52].mxu1  ;;  %v1471_v9 = vpop.f32.mrb[45].mxu0 }
 0x200   :  { %v1664_v10 = vpop.eup %1663  ;;  %v1523_v17 = vpop.f32.mrb[53].mxu1  ;;  %v1472_v11 = vadd.f32 %v1471_v9, %v1470_v4 }
 0x201   :  { %v1473_v13 = vpop.f32.mrb[46].mxu0  ;;  %v1524_v14 = vadd.f32 %v1523_v17, %v1522_v8  ;;  %v1525_v21 = vpop.f32.mrb[54].mxu1  ;;  %v1037_v15 = vpack.c.bf16 %v1664_v10, %v1662_v5 }
 0x202   :  { %v1474_v37 = vpop.f32.mrb[47].mxu0  ;;  %v1526_v22 = vpop.f32.mrb[55].mxu1  ;;  %v900_v8 = vadd.f32 %v1472_v11, %v2061_v59 }
 0x203   :  { %v1475_v23 = vadd.f32 %v1474_v37, %v1473_v13  ;;  %v981_v25 = vadd.f32 %v1524_v14, %v884_v18  ;;  %v1527_v29 = vadd.f32 %v1526_v22, %v1525_v21  ;;  %1564 = vmatpush3.bf16.xpose.msra.mxu0 %v1037_v15 }
 0x204   :  { %1565 = vmatprep.subr.bf16.mxu0 %v1815_v42 }
 0x205   :  { %v984_v30 = vadd.f32 %v1527_v29, %v887_v24  ;;  %1669 = vtanh.f32 %v981_v25  ;;  %v903_v14 = vadd.f32 %v1475_v23, %v2061_v59 }
 0x206   :  { %v1476_v31 = vpop.f32.mrb[48].mxu0  ;;  %v1666_v35 = vpop.eup %1665 }
 0x207   :  { %1671 = vtanh.f32 %v984_v30  ;;  %v1528_v32 = vpop.f32.mrb[56].mxu1  ;;  %v1477_v26 = vpop.f32.mrb[49].mxu0 }
 0x208   :  { %v1478_v39 = vadd.f32 %v1477_v26, %v1476_v31  ;;  %v1529_v43 = vpop.f32.mrb[57].mxu1  ;;  %v1479_v44 = vpop.f32.mrb[50].mxu0 }
 0x209   :  { %v1668_v33 = vpop.eup %1667  ;;  %v1530_v46 = vadd.f32 %v1529_v43, %v1528_v32  ;;  %v1531_v36 = vpop.f32.mrb[58].mxu1 }
 0x20a   :  { %v1480_v47 = vpop.f32.mrb[51].mxu0  ;;  %v1038_v48 = vpack.c.bf16 %v1668_v33, %v1666_v35  ;;  %v1532_v50 = vpop.f32.mrb[59].mxu1  ;;  %v908_v29 = vadd.f32 %v1478_v39, %v2061_v59 }
 0x20b   :  { %v1481_v49 = vadd.f32 %v1480_v47, %v1479_v44  ;;  %v989_v53 = vadd.f32 %v1530_v46, %v892_v45  ;;  %v1533_v54 = vadd.f32 %v1532_v50, %v1531_v36 }
 0x20c   :  { %1566 = vmatpush3.bf16.xpose.msra.mxu0 %v1038_v48 }
 0x20d   :  { %1567 = vmatprep.subr.bf16.mxu0 %v1815_v42  ;;  %v992_v56 = vadd.f32 %v1533_v54, %v895_v51  ;;  %1673 = vtanh.f32 %v989_v53  ;;  %v911_v23 = vadd.f32 %v1481_v49, %v2061_v59 }
 0x20e   :  { %v1482_v61 = vpop.f32.mrb[52].mxu0 }
 0x20f   :  { %1675 = vtanh.f32 %v992_v56  ;;  %v1534_v62 = vpop.f32.mrb[60].mxu1  ;;  %v1483_v63 = vpop.f32.mrb[53].mxu0 }
 0x210   :  { %v1670_v52 = vpop.eup %1669  ;;  %v1484_v0 = vadd.f32 %v1483_v63, %v1482_v61  ;;  %v1535_v3 = vpop.f32.mrb[61].mxu1 }
 0x211   :  { %v1485_v4 = vpop.f32.mrb[54].mxu0  ;;  %v1672_v5 = vpop.eup %1671  ;;  %v1536_v9 = vadd.f32 %v1535_v3, %v1534_v62 }
 0x212   :  { %v1537_v2 = vpop.f32.mrb[62].mxu1  ;;  %v1486_v10 = vpop.f32.mrb[55].mxu0  ;;  %v1039_v18 = vpack.c.bf16 %v1672_v5, %v1670_v52  ;;  %v916_v39 = vadd.f32 %v1484_v0, %v2061_v59 }
 0x213   :  { %v1487_v17 = vadd.f32 %v1486_v10, %v1485_v4  ;;  %v1538_v13 = vpop.f32.mrb[63].mxu1  ;;  %v997_v21 = vadd.f32 %v1536_v9, %v900_v8 }
 0x214   :  { %v1539_v15 = vadd.f32 %v1538_v13, %v1537_v2  ;;  %1568 = vmatpush3.bf16.xpose.msra.mxu0 %v1039_v18 }
 0x215   :  { %1569 = vmatprep.subr.bf16.mxu0 %v1815_v42  ;;  %1677 = vtanh.f32 %v997_v21  ;;  %v919_v49 = vadd.f32 %v1487_v17, %v2061_v59  ;;  %v1035_v59 = vld [vmem:[%s2191_s5] sm:$0x1] }
 0x216   :  { %v1000_v37 = vadd.f32 %v1539_v15, %v903_v14 }
 0x217   :  { %v1540_v22 = vpop.f32.mrb[64].mxu1  ;;  %v1674_v24 = vpop.eup %1673 }
 0x218   :  { %1679 = vtanh.f32 %v1000_v37  ;;  %v1541_v25 = vpop.f32.mrb[65].mxu1 }
 0x219   :  { %v1676_v11 = vpop.eup %1675  ;;  %v1542_v30 = vadd.f32 %v1541_v25, %v1540_v22  ;;  %v1543_v31 = vpop.f32.mrb[66].mxu1  ;;  %v1125_v22 = vld [vmem:[#allocation3] sm:$0x1] }
 0x21a   :  { %v1544_v35 = vpop.f32.mrb[67].mxu1  ;;  %v1040_v32 = vpack.c.bf16 %v1676_v11, %v1674_v24 }
 0x21b   :  { %v1005_v26 = vadd.f32 %v1542_v30, %v908_v29  ;;  %v1545_v33 = vadd.f32 %v1544_v35, %v1543_v31 }
 0x21c   :  { %1570 = vmatpush3.bf16.xpose.msra.mxu0 %v1040_v32 }
 0x21d   :  { %v1008_v43 = vadd.f32 %v1545_v33, %v911_v23  ;;  %1571 = vmatprep.subr.bf16.mxu0 %v1815_v42  ;;  %1681 = vtanh.f32 %v1005_v26 }
 0x21f   :  { %1683 = vtanh.f32 %v1008_v43  ;;  %v1546_v44 = vpop.f32.mrb[68].mxu1  ;;  %v1678_v45 = vpop.eup %1677 }
 0x220   :  { %v1547_v46 = vpop.f32.mrb[69].mxu1 }
 0x221   :  { %v1548_v47 = vadd.f32 %v1547_v46, %v1546_v44  ;;  %v1549_v48 = vpop.f32.mrb[70].mxu1 }
 0x222   :  { %v1680_v36 = vpop.eup %1679  ;;  %v1550_v50 = vpop.f32.mrb[71].mxu1 }
 0x223   :  { %v1041_v51 = vpack.c.bf16 %v1680_v36, %v1678_v45  ;;  %v1013_v53 = vadd.f32 %v1548_v47, %v916_v39  ;;  %v1551_v54 = vadd.f32 %v1550_v50, %v1549_v48 }
 0x225   :  { %1572 = vmatpush3.bf16.xpose.msra.mxu0 %v1041_v51  ;;  %v1016_v56 = vadd.f32 %v1551_v54, %v919_v49  ;;  %1685 = vtanh.f32 %v1013_v53 }
 0x226   :  { %1573 = vmatprep.subr.bf16.mxu0 %v1815_v42 }
 0x227   :  { %1687 = vtanh.f32 %v1016_v56  ;;  %v1682_v61 = vpop.eup %1681 }
 0x229   :  { %v1684_v62 = vpop.eup %1683 }
 0x22a   :  { %v1042_v63 = vpack.c.bf16 %v1684_v62, %v1682_v61 }
 0x22d   :  { %1574 = vmatpush3.bf16.xpose.msra.mxu0 %v1042_v63 }
 0x22e   :  { %1575 = vmatprep.subr.bf16.mxu0 %v1815_v42 }
 0x22f   :  { %v1686_v52 = vpop.eup %1685 }
 0x231   :  { %v1688_v0 = vpop.eup %1687 }
 0x232   :  { %v1043_v3 = vpack.c.bf16 %v1688_v0, %v1686_v52 }
 0x235   :  { %1576 = vmatpush3.bf16.xpose.msra.mxu0 %v1043_v3 }
 0x236   :  { %1186 = vmatprep.subr.bf16.mxu0 %v2001_v57 }
 0x23c   :  { %1578 = vmatmul.mubr.bf16.vlgmr.msra.gmra.mrb[56].mxu0 %v1035_v59 }
 0x23d   :  { %1187 = vmatpush1.bf16.msra.mxu0 %v1999_v55  ;;  %1218 = vmatprep.mubr.bf16.mxu0 %v1814_v1  ;;  %v1817_v1 = vmov -1e+30   ;;  %v79_v55 = vlaneseq }
 0x23e   :  { %1188 = vmatprep.subr.bf16.mxu0 %v2007_v16  ;;  %77 = vst.msk [vmem:[#allocation2] sm:$0x1] %vm76_vm3, %v1817_v1  ;;  %v1048_v16 = vpop.permute.xlu0 %1047 }
 0x23f   :  { %v2109_v57 = vshrl.u32 %v79_v55, 7  ;;  %vm2120_vm5 = vcmp.lt.s32.totalorder %v79_v55, 512 }
 0x240   :  { %83 = vst.msk [vmem:[#allocation4] sm:$0xf] %vm2120_vm5, %v1815_v42 }
 0x241   :  { %1189 = vmatpush1.bf16.msra.mxu0 %v2005_v12  ;;  %v2112_v12 = vsub.s32 0, %v2109_v57 }
 0x242   :  { %1190 = vmatprep.subr.bf16.mxu0 %v2013_v38 }
 0x243   :  { %v1053_v38 = vrot.slane %v1048_v16, %v2112_v12 }
 0x245   :  { %1191 = vmatpush1.bf16.msra.mxu0 %v2011_v34  ;;  %v1095_v34 = vand.u32 127, %v79_v55 }
 0x246   :  { %1192 = vmatprep.subr.bf16.mxu0 %v2019_v60 }
 0x249   :  { %1193 = vmatpush1.bf16.msra.mxu0 %v2017_v58  ;;  %v1101_v58 = vstv %s2186_s0  ;;  %s1818_s0 = smov [#allocation12]  }
 0x24a   :  { %1194 = vmatprep.subr.bf16.mxu0 %v2027_v7  ;;  %vm1102_vm4 = vcmp.lt.s32.totalorder %v1095_v34, %v1101_v58  ;;  %s1309_s23 = sshll.u32 %s1818_s0, 4  ;;  %s1310_s23 = int_to_ptr.vmem [resolvable:$true] %s1309_s23 }
 0x24b   :  { %s1715_s25 = scalar_lea.vmem %s1310_s23, 16  ;;  %s1719_s26 = scalar_lea.vmem %s1310_s23, 32 }
 0x24c   :  { %p1716_p8 = scmp.ne.s32.totalorder %s1310_s23, %s1715_s25  ;;  %p1720_p9 = scmp.lt.s32.totalorder %s1310_s23, %s1310_s23 }
 0x24d   :  { %1195 = vmatpush1.bf16.msra.mxu0 %v2025_v6  ;;  %p1721_p10 = scmp.lt.s32.totalorder %s1719_s26, %s1715_s25 }
 0x24e   :  { %1196 = vmatprep.subr.bf16.mxu0 %v2038_v20 }
 0x24f   :  { %p1722_p11 = por %p1721_p10, %p1720_p9 }
 0x251   :  { %1197 = vmatpush1.bf16.msra.mxu0 %v2036_v19  ;;  %p1723_p12 = pnand %p1722_p11, %p1716_p8 }
 0x252   :  { %1198 = vmatprep.subr.bf16.mxu0 %v2045_v28 }
 0x255   :  { %1199 = vmatpush1.bf16.msra.mxu0 %v2043_v27 }
 0x256   :  { %1200 = vmatprep.subr.bf16.mxu0 %v2051_v41 }
 0x259   :  { %1201 = vmatpush1.bf16.msra.mxu0 %v2049_v40  ;;  %v1105_v40 = vld [vmem:[#allocation2] sm:$0x1] }
 0x30f   :  { %v1088_v60 = vpop.f32.mrb[56].mxu0 }
 0x310   :  { %v1089_v6 = vadd.f32 %v1088_v60, %v1053_v38  ;;  %v1579_v7 = vpop.f32.mrb[57].mxu0 }
 0x311   :  { %v1091_v19 = vpop.f32.mrb[58].mxu0 }
 0x312   :  { %v1103_v20 = vsel %vm1102_vm4, %v1089_v6, -1e+30  ;;  %v1580_v27 = vpop.f32.mrb[59].mxu0 }
 0x313   :  { %1104 = vst [vmem:[#allocation11] sm:$0x1] %v1103_v20  ;;  %v1106_v28 = vsel %vm225_vm0, %v1103_v20, -inf }
 0x314   :  { %1107 = vmax.xlane.f32.xlu0 %v1106_v28 }
 0x3a1   :  { %v1108_v41 = vpop.xlane.xlu0 %1107 }
 0x3a2   :  { %v1109_v4 = vmax.f32 %v1105_v40, %v1108_v41 }
 0x3a4   :  { %v1110_v5 = vsub.f32 %v1105_v40, %v1109_v4  ;;  %1262 = vst.msk [vmem:[#allocation2] sm:$0x1] %vm76_vm3, %v1109_v4  ;;  %1115 = vperm.xlu1 %1600, %v1109_v4  }
 0x3a6   :  { %v1111_v8 = vmul.f32 1.442695, %v1110_v5 }
 0x3a8   :  { %1689 = vpow2.f32 %v1111_v8 }
 0x3ab   :  { %v1266_v37 = vld [vmem:[#allocation2] sm:$0x1] }
 0x3b2   :  { %v1690_v2 = vpop.eup %1689 }
 0x3b3   :  { %1136 = vperm.xlu0 %1599, %v1690_v2   ;;  %v1126_v24 = vmul.f32 %v1690_v2, %v1125_v22 }
 0x423   :  { %v1116_v10 = vpop.permute.xlu1 %1115 }
 0x424   :  { %v1121_v17 = vrot.slane %v1116_v10, %v2112_v12 }
 0x426   :  { %v1122_v13 = vsub.f32 %v1103_v20, %v1121_v17 }
 0x428   :  { %v1123_v18 = vmul.f32 1.442695, %v1122_v13 }
 0x42a   :  { %1691 = vpow2.f32 %v1123_v18 }
 0x434   :  { %v1692_v14 = vpop.eup %1691 }
 0x435   :  { %v1127_v21 = vsel %vm225_vm0, %v1692_v14, 0.0  ;;  %v1144_v15 = vpack.c.bf16 %v1692_v14, %v1692_v14 }
 0x436   :  { %1128 = vadd.xlane.f32.xlu1 %v1127_v21 }
 0x437   :  { %1178 = vmatmul.mubr.bf16.vlgmr.msra.gmra.mrb[72].mxu1 %v1144_v15  ;;  %1219 = vmatmul.mubr.bf16.vlgmr.msra.gmra.mrb[60].mxu0 %v1144_v15 }
 0x447   :  { %1269 = vperm.xlu1 %1600, %v1266_v37  }
 0x4c3   :  { %v1129_v42 = vpop.xlane.xlu1 %1128 }
 0x4c4   :  { %v1130_v25 = vadd.f32 %v1129_v42, %v1126_v24 }
 0x4c6   :  { %1132 = vst.msk [vmem:[#allocation3] sm:$0x1] %vm76_vm3, %v1130_v25 }
 0x4c7   :  { %v1270_v11 = vpop.permute.xlu1 %1269 }
 0x4c8   :  { %v1275_v29 = vrot.slane %v1270_v11, %v2112_v12 }
 0x4ca   :  { %1276 = vst [vmem:[#allocation12] sm:$0x1] %v1275_v29 }
 0x4cd   :  { %v1277_v30 = vld [vmem:[#allocation3] sm:$0x1] }
 0x4ce   :  { %1280 = vperm.xlu0 %1599, %v1277_v30  }
 0x4cf   :  { %1726 = shalt.err (!%p1723_p12)
}
 0x4d0   :  { %s1727_s29 = scalar_lea.hbm %s2194_s8, 16 }
 0x4d1   :  { %p1728_p13 = scmp.ne.s32.totalorder %s2194_s8, %s1727_s29  ;;  %p1731_p0 = scmp.lt.u32.totalorder %s1727_s29, %s2194_s8 }
 0x4d3   :  { %p1733_p1 = pnand %p1731_p0, %p1728_p13 }
 0x4d5   :  { %1736 = shalt.err (!%p1733_p1)
}
 0x4d6   :  { %1312 = dma.vmem_to_hbm [thread:$0]  %s1310_s23, 16, %s2194_s8, [#allocation13]  }
 0x4d7   :  { %s1737_s14 = scalar_lea.vmem %s1300_s24, 16  ;;  %s1741_s15 = scalar_lea.vmem %s1300_s24, 32 }
 0x4d8   :  { %p1738_p2 = scmp.ne.s32.totalorder %s1300_s24, %s1737_s14  ;;  %p1742_p3 = scmp.lt.s32.totalorder %s1300_s24, %s1300_s24 }
 0x4d9   :  { %p1743_p4 = scmp.lt.s32.totalorder %s1741_s15, %s1737_s14 }
 0x4db   :  { %p1744_p5 = por %p1743_p4, %p1742_p3 }
 0x4dd   :  { %p1745_p6 = pnand %p1744_p5, %p1738_p2 }
 0x4df   :  { %1748 = shalt.err (!%p1745_p6)
}
 0x4e0   :  { %s1749_s18 = scalar_lea.hbm %s2193_s7, 16 }
 0x4e1   :  { %p1750_p7 = scmp.ne.s32.totalorder %s2193_s7, %s1749_s18  ;;  %p1753_p8 = scmp.lt.u32.totalorder %s1749_s18, %s2193_s7 }
 0x4e3   :  { %p1755_p9 = pnand %p1753_p8, %p1750_p7 }
 0x4e5   :  { %1758 = shalt.err (!%p1755_p9)
}
 0x4e6   :  { %1302 = dma.vmem_to_hbm [thread:$0]  %s1300_s24, 16, %s2193_s7, [#allocation10]   ;;  %v1820_v31 = vmov 1966171168   ;;  %v1137_v23 = vpop.permute.xlu0 %1136  ;;  %v1133_v54 = vld [vmem:[#allocation4] sm:$0xf] }
 0x4e7   :  { %v1234_v35 = vunpack.c.l.s4 %v1820_v31  ;;  %v1142_v51 = vrot.slane %v1137_v23, %v2112_v12  ;;  %s1821_s7 = smov [#allocation15]  }
 0x4e8   :  { %s1329_s5 = sshll.u32 %s1821_s7, 4  ;;  %s1330_s5 = int_to_ptr.vmem [resolvable:$true] %s1329_s5 }
 0x4e9   :  { %v1235_v32 = vunpack.c.0.s8 %v1234_v35  ;;  %v1143_v61 = vmul.f32 %v1142_v51, %v1133_v54  ;;  %s1759_s22 = scalar_lea.vmem %s1330_s5, 64  ;;  %p1764_p11 = scmp.lt.s32.totalorder %s1330_s5, %s1330_s5 }
 0x4ea   :  { %p1760_p10 = scmp.ne.s32.totalorder %s1330_s5, %s1759_s22  ;;  %p1765_p12 = scmp.lt.s32.totalorder %s1759_s22, %s1759_s22 }
 0x4eb   :  { %v1238_v43 = vsub.s32 %v1235_v32, %v2109_v57 }
 0x4ec   :  { %p1766_p13 = por %p1765_p12, %p1764_p11 }
 0x4ee   :  { %p1767_p0 = pnand %p1766_p13, %p1760_p10 }
 0x50a   :  { %v1179_v26 = vpop.f32.mrb[72].mxu1  ;;  %v1220_v33 = vpop.f32.mrb[60].mxu0 }
 0x50b   :  { %v1181_v44 = vpop.f32.mrb[73].mxu1  ;;  %v1222_v45 = vpop.f32.mrb[61].mxu0 }
 0x50c   :  { %v1231_v46 = vcombine.low %v1179_v26, %v1181_v44  ;;  %v1232_v36 = vcombine.low %v1220_v33, %v1222_v45  ;;  %v1183_v39 = vpop.f32.mrb[74].mxu1  ;;  %v1224_v47 = vpop.f32.mrb[62].mxu0 }
 0x50d   :  { %v1184_v48 = vpop.f32.mrb[75].mxu1  ;;  %v1225_v50 = vpop.f32.mrb[63].mxu0 }
 0x50e   :  { %v1239_v49 = vrot.slane %v1231_v46, %v1238_v43  ;;  %v1246_v53 = vrot.slane %v1232_v36, %v1238_v43 }
 0x510   :  { %v1247_v56 = vcombine.low %v1239_v49, %v1246_v53 }
 0x512   :  { %v1254_v62 = vrot.slane %v1247_v56, %v1238_v43 }
 0x514   :  { %v1256_v63 = vadd.f32 %v1254_v62, %v1143_v61 }
 0x516   :  { %1261 = vst.msk [vmem:[#allocation4] sm:$0xf] %vm2120_vm5, %v1256_v63 }
 0x51d   :  { %v1288_v52 = vld [vmem:[#allocation4] sm:$0xf] }
 0x51e   :  { %1289 = vst.msk [vmem:[#allocation15] sm:$0xf] %vm2120_vm5, %v1288_v52 }
 0x51f   :  { %1770 = shalt.err (!%p1767_p0)
}
 0x520   :  { %s1771_s6 = scalar_lea.hbm %s2196_s10, 64 }
 0x521   :  { %p1772_p1 = scmp.ne.s32.totalorder %s2196_s10, %s1771_s6  ;;  %p1775_p2 = scmp.lt.u32.totalorder %s1771_s6, %s2196_s10 }
 0x523   :  { %p1777_p3 = pnand %p1775_p2, %p1772_p1 }
 0x525   :  { %1780 = shalt.err (!%p1777_p3)
}
 0x526   :  { %1332 = dma.vmem_to_hbm [thread:$0]  %s1330_s5, 64, %s2196_s10, [#allocation16]  }
 0x527   :  { %s1822_s30 = smov [#allocation14]  }
 0x528   :  { %s1319_s11 = sshll.u32 %s1822_s30, 4  ;;  %s1320_s11 = int_to_ptr.vmem [resolvable:$true] %s1319_s11 }
 0x529   :  { %s1781_s3 = scalar_lea.vmem %s1320_s11, 16  ;;  %s1785_s12 = scalar_lea.vmem %s1320_s11, 32 }
 0x52a   :  { %p1782_p4 = scmp.ne.s32.totalorder %s1320_s11, %s1781_s3  ;;  %p1786_p5 = scmp.lt.s32.totalorder %s1320_s11, %s1320_s11 }
 0x52b   :  { %p1787_p6 = scmp.lt.s32.totalorder %s1785_s12, %s1781_s3 }
 0x52d   :  { %p1788_p7 = por %p1787_p6, %p1786_p5 }
 0x52f   :  { %p1789_p8 = pnand %p1788_p7, %p1782_p4 }
 0x54d   :  { %v1281_v0 = vpop.permute.xlu0 %1280 }
 0x54e   :  { %v1286_v3 = vrot.slane %v1281_v0, %v2112_v12 }
 0x550   :  { %1287 = vst [vmem:[#allocation14] sm:$0x1] %v1286_v3 }
 0x551   :  { %1792 = shalt.err (!%p1789_p8)
}
 0x552   :  { %s1793_s14 = scalar_lea.hbm %s2195_s9, 16 }
 0x553   :  { %p1794_p9 = scmp.ne.s32.totalorder %s2195_s9, %s1793_s14  ;;  %p1797_p10 = scmp.lt.u32.totalorder %s1793_s14, %s2195_s9 }
 0x555   :  { %p1799_p11 = pnand %p1797_p10, %p1794_p9 }
 0x557   :  { %1802 = shalt.err (!%p1799_p11)
}
 0x558   :  { %1322 = dma.vmem_to_hbm [thread:$0]  %s1320_s11, 16, %s2195_s9, [#allocation13]  }
 0x559   :  { %1805 = dma.done.wait [#allocation10], 16  }
 0x55a   :  { %1806 = vsyncadd [#allocation10], 4294967280 }
 0x55b   :  { %1807 = dma.done.wait [#allocation13], 32  }
 0x55c   :  { %1808 = vsyncadd [#allocation13], 4294967264 }
 0x55d   :  { %1809 = dma.done.wait [#allocation16], 64  }
 0x55e   :  { %1810 = vsyncadd [#allocation16], 4294967232 }
 0x55f   :  { %1345 = vsyncpa [#allocation9], 1 }
 0x560   :  { %1346 = vsyncpa [#allocation10], 1 }
 0x561   :  { %1347 = vsyncpa [#allocation13], 1 }
 0x562   :  { %1348 = vsyncpa [#allocation16], 1 }

</bundles_post_ra>
